<compile_context>
chip_gen: v6e
topology: v6e:2x2x1
jax: 0.10.0
libtpu: 0.0.40
codegen_flags: <defaults>
</compile_context>

<pallas_src>
import functools

import jax
import jax.numpy as jnp
import numpy as np
from jax.experimental import pallas as pl
from jax.experimental.pallas import tpu as pltpu

_MiB = 1024 * 1024


def _vmem_capacity_bytes():
    """Physical VMEM per TensorCore; conservative (v7x = 64 MiB) fallback."""
    try:
        cap = getattr(pltpu.get_tpu_info(), "vmem_capacity_bytes", None)
        if cap:
            return int(cap)
    except Exception:
        pass
    return 64 * _MiB


def _sublane_multiple(dtype):
    """Rows per sublane group: 8 for 4-byte, 16 for 2-byte, 32 for 1-byte dtypes."""
    return max(8, 32 // np.dtype(dtype).itemsize)


def _round_up(x, m):
    return ((x + m - 1) // m) * m


# ----------------------------- kernels ---------------------------------------
def _dma_concat_kernel(inner_sizes, offsets, n, *args):
    """HBM->HBM: one strided async copy per input into its lane range of out."""
    x_refs = args[:n]
    o_ref = args[n]
    sem = args[n + 1]
    copies = []
    for i in range(n):
        off, sz = offsets[i], inner_sizes[i]
        cp = pltpu.make_async_copy(x_refs[i], o_ref.at[:, off:off + sz], sem.at[i])
        cp.start()
        copies.append(cp)
    for cp in copies:
        cp.wait()


def _staged_concat_kernel(inner_sizes, offsets, *refs):
    """VMEM-staged: copy each input block into a static lane-slice of the output block."""
    o_ref = refs[-1]
    for x_ref, off, sz in zip(refs[:-1], offsets, inner_sizes):
        # Static slice -> zero-cost view; lane-dense store when sz/off are 128-aligned.
        # (pltpu.sync_copy would move this off the vst slots, but at the tiny row
        #  widths that reach this path the store is already hidden under the DMA.)
        o_ref[:, off:off + sz] = x_ref[...]


# ----------------------------- wrapper ----------------------------------------
def concat_pallas(xs, dim=1):
    """Pallas equivalent of torch.cat(xs, dim)."""
    xs = list(xs)
    assert len(xs) >= 1
    nd = xs[0].ndim
    d = dim % nd
    lead = xs[0].shape[:d]
    trail = xs[0].shape[d + 1:]
    dtype = xs[0].dtype
    for x in xs:
        assert x.shape[:d] == lead and x.shape[d + 1:] == trail, "non-concat dims must match"
        assert x.dtype == dtype, "dtypes must match"

    outer = int(np.prod(lead)) if lead else 1
    inners = [int(np.prod(x.shape[d:])) for x in xs]
    total = int(sum(inners))
    offsets = [0]
    for s in inners:
        offsets.append(offsets[-1] + s)
    offsets = offsets[:-1]
    out_full_shape = lead + (sum(int(x.shape[d]) for x in xs),) + trail

    if outer == 0 or total == 0:
        return jnp.zeros(out_full_shape, dtype)

    # Free (contiguous row-major) reshapes to (outer, inner_i).
    xs2d = [x.reshape(outer, inner) for x, inner in zip(xs, inners)]

    itemsize = np.dtype(dtype).itemsize
    cap = _vmem_capacity_bytes()
    sub_mult = _sublane_multiple(dtype)
    n = len(xs2d)

    # Per-block VMEM budget for the staged path (generation-aware):
    #   v7x (64 MiB): ~14 MiB/block -> ~28 MiB double-buffered; v5e/v6e: ~30 MiB/block.
    budget = int(min(40 * _MiB, max(8 * _MiB, cap // 4 - 2 * _MiB)))

    min_row_bytes = min(inners) * itemsize
    min_staged_block_bytes = 2 * sub_mult * total * itemsize  # in + out at minimal tile
    use_dma = (min_row_bytes >= 512) or (min_staged_block_bytes > budget)

    if use_dma:
        # ---------------- direct HBM->HBM DMA path ----------------
        kernel = functools.partial(_dma_concat_kernel, tuple(inners), tuple(offsets), n)
        out2d = pl.pallas_call(
            kernel,
            out_shape=jax.ShapeDtypeStruct((outer, total), dtype),
            in_specs=[pl.BlockSpec(memory_space=pl.ANY)] * n,
            out_specs=pl.BlockSpec(memory_space=pl.ANY),
            scratch_shapes=[pltpu.SemaphoreType.DMA((n,))],
        )(*xs2d)
        return out2d.reshape(out_full_shape)

    # ---------------- VMEM-staged path (tiny rows) ----------------
    bytes_per_row = itemsize * 2 * total  # inputs + output live per outer row
    rows = max(1, budget // max(bytes_per_row, 1))
    tile = min(outer, max(sub_mult, (rows // sub_mult) * sub_mult))
    # Guarantee >=2 grid steps when there is enough work so v7x's second TC gets a share.
    if outer >= 2 * sub_mult:
        tile = min(tile, _round_up(-(-outer // 2), sub_mult))
    if tile >= outer:
        tile = outer
    grid = (pl.cdiv(outer, tile),)
    # TODO(synk): inner-axis (2-D) tiling for the staged path; not needed because any
    # block too wide for the budget is routed to the DMA path above.

    kernel = functools.partial(_staged_concat_kernel, tuple(inners), tuple(offsets))
    in_specs = [pl.BlockSpec((tile, inner), lambda j: (j, 0)) for inner in inners]
    out_spec = pl.BlockSpec((tile, total), lambda j: (j, 0))

    # Realistic VMEM limit: double-buffered in+out blocks plus margin, with headroom
    # below physical capacity (never the full 64 MiB on v7x).
    footprint = 4 * tile * total * itemsize
    vmem_limit = int(min(cap - 12 * _MiB, max(32 * _MiB, footprint + 8 * _MiB)))

    out2d = pl.pallas_call(
        kernel,
        out_shape=jax.ShapeDtypeStruct((outer, total), dtype),
        grid=grid,
        in_specs=in_specs,
        out_specs=out_spec,
        compiler_params=pltpu.CompilerParams(
            dimension_semantics=("parallel",),
            vmem_limit_bytes=vmem_limit,
        ),
    )(*xs2d)
    return out2d.reshape(out_full_shape)


# ------------------------------ Reference -------------------------------------
def concat_reference(xs, dim=1):
    return jnp.concatenate(xs, axis=dim)


if __name__ == "__main__":
    key = jax.random.PRNGKey(0)
    keys = jax.random.split(key, 7)

    # 1) default d=1 channel concat (NCHW) -- large rows -> HBM->HBM DMA path
    x0 = jax.random.normal(keys[0], (2, 4, 16, 16), jnp.float32)
    x1 = jax.random.normal(keys[1], (2, 8, 16, 16), jnp.float32)
    x2 = jax.random.normal(keys[2], (2, 4, 16, 16), jnp.float32)
    xs = [x0, x1, x2]
    y = jax.block_until_ready(concat_pallas(xs, dim=1))
    y_ref = jax.block_until_ready(concat_reference(xs, dim=1))
    assert y.shape == (2, 16, 16, 16)
    np.testing.assert_array_equal(np.asarray(y), np.asarray(y_ref))

    # 2) d=0 row concat -- flat-buffer concatenation, contiguous DMA path
    a0 = jax.random.normal(keys[3], (2, 4, 16, 16), jnp.float32)
    a1 = jax.random.normal(keys[4], (3, 4, 16, 16), jnp.float32)
    z = jax.block_until_ready(concat_pallas([a0, a1], dim=0))
    z_ref = jax.block_until_ready(concat_reference([a0, a1], dim=0))
    assert z.shape == (5, 4, 16, 16)
    np.testing.assert_array_equal(np.asarray(z), np.asarray(z_ref))

    # 3) last-dim concat with tiny rows (64 B) -> VMEM-staged path, >=2 parallel steps
    b0 = jax.random.normal(keys[5], (2, 4, 16, 16), jnp.float32)
    b1 = jax.random.normal(keys[6], (2, 4, 16, 16), jnp.float32)
    w = jax.block_until_ready(concat_pallas([b0, b1], dim=3))
    w_ref = jax.block_until_ready(concat_reference([b0, b1], dim=3))
    assert w.shape == (2, 4, 16, 32)
    np.testing.assert_array_equal(np.asarray(w), np.asarray(w_ref))

    print("KERNEL_OK")
</pallas_src>

<mosaic_0001>
module attributes {stable_mosaic.version = 11 : i64} {
  func.func @_dma_concat_kernel(%arg0: memref<2x1024xf32, #tpu.memory_space<any>>, %arg1: memref<2x2048xf32, #tpu.memory_space<any>>, %arg2: memref<2x1024xf32, #tpu.memory_space<any>>, %arg3: memref<2x4096xf32, #tpu.memory_space<any>>, %arg4: memref<3x!tpu.dma_semaphore, #tpu.memory_space<semaphore_mem>>) attributes {dimension_semantics = [], scalar_prefetch = 0 : i64, scratch_operands = 1 : i64, tpu.core_type = #tpu.core_type<tc>} {
    %c0_i32 = arith.constant 0 : i32
    %c0_i32_0 = arith.constant 0 : i32
    %c0_i32_1 = arith.constant 0 : i32
    %0 = tpu.memref_slice %arg3[%c0_i32_0, %c0_i32_1] : memref<2x4096xf32, #tpu.memory_space<any>> -> memref<2x1024xf32, #tpu.memory_space<any>>
    %1 = tpu.memref_slice %arg4[%c0_i32] : memref<3x!tpu.dma_semaphore, #tpu.memory_space<semaphore_mem>> -> memref<1x!tpu.dma_semaphore, #tpu.memory_space<semaphore_mem>>
    %2 = tpu.memref_squeeze %1 : memref<1x!tpu.dma_semaphore, #tpu.memory_space<semaphore_mem>> -> memref<!tpu.dma_semaphore, #tpu.memory_space<semaphore_mem>>
    tpu.enqueue_dma source(%arg0 : memref<2x1024xf32, #tpu.memory_space<any>>) target(%0 : memref<2x1024xf32, #tpu.memory_space<any>>) target_semaphore(%2 : memref<!tpu.dma_semaphore, #tpu.memory_space<semaphore_mem>>)
    %c1_i32 = arith.constant 1 : i32
    %c0_i32_2 = arith.constant 0 : i32
    %c1024_i32 = arith.constant 1024 : i32
    %3 = tpu.memref_slice %arg3[%c0_i32_2, %c1024_i32] : memref<2x4096xf32, #tpu.memory_space<any>> -> memref<2x2048xf32, #tpu.memory_space<any>>
    %4 = tpu.memref_slice %arg4[%c1_i32] : memref<3x!tpu.dma_semaphore, #tpu.memory_space<semaphore_mem>> -> memref<1x!tpu.dma_semaphore, #tpu.memory_space<semaphore_mem>>
    %5 = tpu.memref_squeeze %4 : memref<1x!tpu.dma_semaphore, #tpu.memory_space<semaphore_mem>> -> memref<!tpu.dma_semaphore, #tpu.memory_space<semaphore_mem>>
    tpu.enqueue_dma source(%arg1 : memref<2x2048xf32, #tpu.memory_space<any>>) target(%3 : memref<2x2048xf32, #tpu.memory_space<any>>) target_semaphore(%5 : memref<!tpu.dma_semaphore, #tpu.memory_space<semaphore_mem>>)
    %c2_i32 = arith.constant 2 : i32
    %c0_i32_3 = arith.constant 0 : i32
    %c3072_i32 = arith.constant 3072 : i32
    %6 = tpu.memref_slice %arg3[%c0_i32_3, %c3072_i32] : memref<2x4096xf32, #tpu.memory_space<any>> -> memref<2x1024xf32, #tpu.memory_space<any>>
    %7 = tpu.memref_slice %arg4[%c2_i32] : memref<3x!tpu.dma_semaphore, #tpu.memory_space<semaphore_mem>> -> memref<1x!tpu.dma_semaphore, #tpu.memory_space<semaphore_mem>>
    %8 = tpu.memref_squeeze %7 : memref<1x!tpu.dma_semaphore, #tpu.memory_space<semaphore_mem>> -> memref<!tpu.dma_semaphore, #tpu.memory_space<semaphore_mem>>
    tpu.enqueue_dma source(%arg2 : memref<2x1024xf32, #tpu.memory_space<any>>) target(%6 : memref<2x1024xf32, #tpu.memory_space<any>>) target_semaphore(%8 : memref<!tpu.dma_semaphore, #tpu.memory_space<semaphore_mem>>)
    %c0_i32_4 = arith.constant 0 : i32
    %c0_i32_5 = arith.constant 0 : i32
    %c0_i32_6 = arith.constant 0 : i32
    %9 = tpu.memref_slice %arg3[%c0_i32_5, %c0_i32_6] : memref<2x4096xf32, #tpu.memory_space<any>> -> memref<2x1024xf32, #tpu.memory_space<any>>
    %10 = tpu.memref_slice %arg4[%c0_i32_4] : memref<3x!tpu.dma_semaphore, #tpu.memory_space<semaphore_mem>> -> memref<1x!tpu.dma_semaphore, #tpu.memory_space<semaphore_mem>>
    %11 = tpu.memref_squeeze %10 : memref<1x!tpu.dma_semaphore, #tpu.memory_space<semaphore_mem>> -> memref<!tpu.dma_semaphore, #tpu.memory_space<semaphore_mem>>
    tpu.wait_dma2 semaphore(%11 : memref<!tpu.dma_semaphore, #tpu.memory_space<semaphore_mem>>) src(%arg0 : memref<2x1024xf32, #tpu.memory_space<any>>) dst(%9 : memref<2x1024xf32, #tpu.memory_space<any>>)
    %c1_i32_7 = arith.constant 1 : i32
    %c0_i32_8 = arith.constant 0 : i32
    %c1024_i32_9 = arith.constant 1024 : i32
    %12 = tpu.memref_slice %arg3[%c0_i32_8, %c1024_i32_9] : memref<2x4096xf32, #tpu.memory_space<any>> -> memref<2x2048xf32, #tpu.memory_space<any>>
    %13 = tpu.memref_slice %arg4[%c1_i32_7] : memref<3x!tpu.dma_semaphore, #tpu.memory_space<semaphore_mem>> -> memref<1x!tpu.dma_semaphore, #tpu.memory_space<semaphore_mem>>
    %14 = tpu.memref_squeeze %13 : memref<1x!tpu.dma_semaphore, #tpu.memory_space<semaphore_mem>> -> memref<!tpu.dma_semaphore, #tpu.memory_space<semaphore_mem>>
    tpu.wait_dma2 semaphore(%14 : memref<!tpu.dma_semaphore, #tpu.memory_space<semaphore_mem>>) src(%arg1 : memref<2x2048xf32, #tpu.memory_space<any>>) dst(%12 : memref<2x2048xf32, #tpu.memory_space<any>>)
    %c2_i32_10 = arith.constant 2 : i32
    %c0_i32_11 = arith.constant 0 : i32
    %c3072_i32_12 = arith.constant 3072 : i32
    %15 = tpu.memref_slice %arg3[%c0_i32_11, %c3072_i32_12] : memref<2x4096xf32, #tpu.memory_space<any>> -> memref<2x1024xf32, #tpu.memory_space<any>>
    %16 = tpu.memref_slice %arg4[%c2_i32_10] : memref<3x!tpu.dma_semaphore, #tpu.memory_space<semaphore_mem>> -> memref<1x!tpu.dma_semaphore, #tpu.memory_space<semaphore_mem>>
    %17 = tpu.memref_squeeze %16 : memref<1x!tpu.dma_semaphore, #tpu.memory_space<semaphore_mem>> -> memref<!tpu.dma_semaphore, #tpu.memory_space<semaphore_mem>>
    tpu.wait_dma2 semaphore(%17 : memref<!tpu.dma_semaphore, #tpu.memory_space<semaphore_mem>>) src(%arg2 : memref<2x1024xf32, #tpu.memory_space<any>>) dst(%15 : memref<2x1024xf32, #tpu.memory_space<any>>)
    return
  }
}

</mosaic_0001>

<bundles_post_ra>
// kernel: tpu_custom_call.1
= control target key start
LH: loop header
LB: loop body
LE: loop exit
PB: predicated region body
PF: predicated region fallthrough
CT: control target
= control target key end

     0   :  { %s76_s15 = smov [#allocation2]   ;;  %s77_s16 = smov 131072   ;;  %s119_s0 = inlined_call_operand.hbm [shape: f32[2,1024], index: 0, kind: input, shape index: {}]   ;;  %s120_s3 = inlined_call_operand.hbm [shape: f32[2,4096], index: 3, kind: output, shape index: {}]   ;;  %s121_s1 = inlined_call_operand.hbm [shape: f32[2,2048], index: 1, kind: input, shape index: {}]   ;;  %s122_s2 = inlined_call_operand.hbm [shape: f32[2,1024], index: 2, kind: input, shape index: {}]  }
   0x1   :  { %s15_s14 = scalar_lea.hbm %s120_s3, 256  ;;  %s78_s17 = smov 0  }
   0x2   :  { %14 = dma.general %s119_s0, 256, %s120_s3, %s76_s15, %s77_s16, [#allocation4], %s78_s17, 0  }
   0x3   :  { %s24_s24 = scalar_lea.hbm %s120_s3, 768  ;;  %s79_s25 = smov [#allocation2 + $0x1]  }
   0x4   :  { %23 = dma.general %s121_s1, 512, %s15_s14, %s79_s25, %s77_s16, [#allocation6], %s78_s17, 0  }
   0x5   :  { %s80_s28 = smov [#allocation2 + $0x2]  }
   0x6   :  { %32 = dma.general %s122_s2, 256, %s24_s24, %s80_s28, %s77_s16, [#allocation8], %s78_s17, 0  }
   0x7   :  { %70 = dma.done.wait [#allocation2], 256 }
   0x8   :  { %71 = vsyncadd [#allocation2], 4294967040 }
   0x9   :  { %72 = dma.done.wait [#allocation2 + $0x1], 512 }
   0xa   :  { %73 = vsyncadd [#allocation2 + $0x1], 4294966784 }
   0xb   :  { %74 = dma.done.wait [#allocation2 + $0x2], 256 }
   0xc   :  { %75 = vsyncadd [#allocation2 + $0x2], 4294967040 }
   0xd   :  { %42 = vsyncmov [#allocation2] }
  0x10   :  { %s43_s0 = vpop.sfrf %42 }
  0x11   :  { %p62_p0 = scmp.ne.s32.totalorder %s43_s0, 0 }
  0x13   :  { %47 = shalt.err (%p62_p0)  }
  0x14   :  { %49 = vsyncmov [#allocation2 + $0x1] }
  0x17   :  { %s50_s3 = vpop.sfrf %49 }
  0x18   :  { %p63_p1 = scmp.ne.s32.totalorder %s50_s3, 0 }
  0x1a   :  { %54 = shalt.err (%p63_p1)  }
  0x1b   :  { %56 = vsyncmov [#allocation2 + $0x2] }
  0x1e   :  { %s57_s1 = vpop.sfrf %56 }
  0x1f   :  { %p64_p2 = scmp.ne.s32.totalorder %s57_s1, 0 }
  0x21   :  { %61 = shalt.err (%p64_p2)  }

</bundles_post_ra>
